<compile_context>
chip_gen: v7x
topology: tpu7x:2x2x1
jax: 0.10.0
libtpu: 0.0.40
codegen_flags: <defaults>
</compile_context>

<pallas_src>
import functools

import jax
import jax.numpy as jnp
from jax.experimental import pallas as pl
from jax.experimental.pallas import tpu as pltpu


def _stack_kernel(x_ref, g1_ref, be1_ref, w1_ref, b1_ref,
                  w2_ref, b2_ref, g2_ref, be2_ref,
                  out_ref, acc_ref, *, eps):
    """Runs every layer for one (ROW_TILE, H) tile of rows.

    Grid = (row_tiles, num_layers); the layer axis is innermost ("arbitrary").
    The activation carry lives in an fp32 VMEM scratch across the layer axis.
    """
    layer = pl.program_id(1)
    last = pl.num_programs(1) - 1

    @pl.when(layer == 0)
    def _():
        acc_ref[...] = x_ref[...].astype(jnp.float32)

    def layer_norm(v, g, beta):
        mu = jnp.mean(v, axis=-1, keepdims=True)
        var = jnp.mean(jnp.square(v - mu), axis=-1, keepdims=True)
        return (v - mu) * jax.lax.rsqrt(var + eps) * g + beta

    x = acc_ref[...]                                            # fp32 (T, H)

    # gcnn_x = bn_after_gcnn(x)   (gated conv is dead code in the reference)
    gx = layer_norm(x, g1_ref[...], be1_ref[...])

    # feed-forward: relu(gx @ W1 + b1) @ W2 + b2, residual, LayerNorm.
    # bf16 operands, fp32 MXU accumulation.
    ff1 = jnp.dot(gx.astype(jnp.bfloat16), w1_ref[...],
                  preferred_element_type=jnp.float32) + b1_ref[...]
    ff1 = jnp.maximum(ff1, 0.0)
    ff2 = jnp.dot(ff1.astype(jnp.bfloat16), w2_ref[...],
                  preferred_element_type=jnp.float32) + b2_ref[...]

    y = layer_norm(ff2 + gx, g2_ref[...], be2_ref[...])
    acc_ref[...] = y                                            # carry to next layer

    @pl.when(layer == last)
    def _():
        out_ref[...] = y.astype(out_ref.dtype)


def _round_up(n, m):
    return (n + m - 1) // m * m


def _vmem_capacity_bytes():
    try:
        return int(pltpu.get_tpu_info().vmem_capacity_bytes)
    except Exception:
        return 64 << 20   # conservative fallback: v7x per-core VMEM


def _pick_row_tile(rows, hidden, vmem_cap):
    """Largest (8-aligned) row tile that fits the per-core VMEM budget."""
    budget = int(vmem_cap * 0.60)
    weight_bytes = 4 * hidden * hidden * 2          # W1+W2, double-buffered, bf16
    per_row_bytes = 40 * hidden                     # in/out dbl-buffered + carry + live fp32 temps
    tile = max(8, (budget - weight_bytes) // max(per_row_bytes, 1))
    tile = min(int(tile), 1024)
    tile = max(8, (tile // 8) * 8)
    # Guarantee >= 2 row tiles when rows allow so the "parallel" axis can shard
    # across both TensorCores on v7x (no effect on single-TC v5e/v6e).
    half = max(8, _round_up((rows + 1) // 2, 8))
    return min(tile, half)


@functools.partial(jax.jit, static_argnames=("eps",))
def _stack_impl(x, params, *, eps):
    B, L, H = x.shape
    num_layers = len(params)
    rows = B * L

    vmem_cap = _vmem_capacity_bytes()
    row_tile = _pick_row_tile(rows, H, vmem_cap)
    rows_pad = _round_up(rows, row_tile)

    x2 = x.reshape(rows, H)
    if rows_pad != rows:
        # Padded rows never mix with real rows (all math is row-wise; var+eps
        # keeps LN finite); sliced off at the end.
        x2 = jnp.pad(x2, ((0, rows_pad - rows), (0, 0)))

    # Stack per-layer params once (single cast/stack, not one per layer) so the
    # kernel walks layers on an inner grid axis with auto-prefetched weights.
    w1 = jnp.stack([p["w1"] for p in params]).astype(jnp.bfloat16)   # (NL, H, H)
    w2 = jnp.stack([p["w2"] for p in params]).astype(jnp.bfloat16)
    b1 = jnp.stack([p["b1"] for p in params])                        # (NL, 1, H)
    b2 = jnp.stack([p["b2"] for p in params])
    g1 = jnp.stack([p["g1"] for p in params])
    be1 = jnp.stack([p["be1"] for p in params])
    g2 = jnp.stack([p["g2"] for p in params])
    be2 = jnp.stack([p["be2"] for p in params])

    grid = (rows_pad // row_tile, num_layers)
    row_spec = pl.BlockSpec((row_tile, H), lambda i, l: (i, 0))       # DMA'd only when i changes
    vec_spec = pl.BlockSpec((None, 1, H), lambda i, l: (l, 0, 0))     # per-layer, double-buffered
    mat_spec = pl.BlockSpec((None, H, H), lambda i, l: (l, 0, 0))     # per-layer, double-buffered

    # Honest VMEM estimate (double buffers counted):
    est = (2 * 2 * row_tile * H * 4            # x / out tiles, double-buffered
           + row_tile * H * 4                  # fp32 carry scratch
           + 4 * H * H * 2                     # W1 / W2 bf16, double-buffered
           + 8 * 2 * H * 4                     # gains / biases, double-buffered
           + 6 * row_tile * H * 4)             # live temporaries (gx, ff1, ff2, casts)
    vmem_limit = int(min(max(est + (8 << 20), 32 << 20), vmem_cap * 7 // 8))

    kern = functools.partial(_stack_kernel, eps=eps)
    out = pl.pallas_call(
        kern,
        out_shape=jax.ShapeDtypeStruct((rows_pad, H), x.dtype),
        grid_spec=pltpu.PrefetchScalarGridSpec(
            num_scalar_prefetch=0,
            grid=grid,
            in_specs=[row_spec,                 # x tile
                      vec_spec, vec_spec,       # g1, be1
                      mat_spec, vec_spec,       # W1, b1
                      mat_spec, vec_spec,       # W2, b2
                      vec_spec, vec_spec],      # g2, be2
            out_specs=row_spec,
            scratch_shapes=[pltpu.VMEM((row_tile, H), jnp.float32)]),
        compiler_params=pltpu.CompilerParams(
            dimension_semantics=("parallel", "arbitrary"),
            vmem_limit_bytes=vmem_limit),
    )(x2, g1, be1, w1, b1, w2, b2, g2, be2)

    if rows_pad != rows:
        out = out[:rows]
    return out.reshape(B, L, H)


def stack_gated_cnn(x, params, *, kernel_size=None, eps=1e-5):
    """x: (B, L, H) float32.  params: list of per-layer dicts.

    `kernel_size` is accepted for API parity with the PyTorch module but unused:
    the reference forward feeds `x` (not `gcnn_x`) to bn_after_gcnn, so the
    gated-conv weights never influence the output.
    """
    del kernel_size
    return _stack_impl(x, params, eps=eps)


def init_params(key, num_layers, hidden, kernel_size):
    params = []
    bc = 1.0 / (hidden * kernel_size) ** 0.5   # conv init bound (fan_in = H*K)
    bl = 1.0 / hidden ** 0.5                   # linear init bound
    for i in range(num_layers):
        ks = jax.random.split(jax.random.fold_in(key, i), 6)
        params.append(dict(
            # wa/wb mirror the PyTorch module's conv parameters; the reference
            # forward discards the gated-conv result, so they never affect the
            # output and are not fed to the kernel.
            wa=jax.random.uniform(ks[0], (kernel_size, hidden, hidden), jnp.float32, -bc, bc),
            wb=jax.random.uniform(ks[1], (kernel_size, hidden, hidden), jnp.float32, -bc, bc),
            w1=jax.random.uniform(ks[2], (hidden, hidden), jnp.float32, -bl, bl),
            b1=jax.random.uniform(ks[3], (1, hidden), jnp.float32, -bl, bl),
            w2=jax.random.uniform(ks[4], (hidden, hidden), jnp.float32, -bl, bl),
            b2=jax.random.uniform(ks[5], (1, hidden), jnp.float32, -bl, bl),
            g1=jnp.ones((1, hidden), jnp.float32), be1=jnp.zeros((1, hidden), jnp.float32),
            g2=jnp.ones((1, hidden), jnp.float32), be2=jnp.zeros((1, hidden), jnp.float32),
        ))
    return params


def _reference(x, params, *, eps=1e-5):
    """Pure-JAX replica of the PyTorch forward (bf16 matmuls mirror the kernel)."""
    def ln(v, g, b):
        mu = jnp.mean(v, axis=-1, keepdims=True)
        var = jnp.mean(jnp.square(v - mu), axis=-1, keepdims=True)
        return (v - mu) * jax.lax.rsqrt(var + eps) * g + b
    for p in params:
        # gated conv is computed but discarded by the reference forward
        gx = ln(x, p["g1"][0], p["be1"][0])
        ff1 = jax.nn.relu(
            jnp.dot(gx.astype(jnp.bfloat16), p["w1"].astype(jnp.bfloat16),
                    preferred_element_type=jnp.float32) + p["b1"][0])
        ff2 = jnp.dot(ff1.astype(jnp.bfloat16), p["w2"].astype(jnp.bfloat16),
                      preferred_element_type=jnp.float32) + p["b2"][0]
        x = ln(ff2 + gx, p["g2"][0], p["be2"][0])
    return x


if __name__ == "__main__":
    config = dict(hidden_size=32, kernel_size=3, num_layers=2)
    B, L, H = 2, 8, config["hidden_size"]

    key = jax.random.PRNGKey(0)
    kx, kp = jax.random.split(key)
    x = jax.random.normal(kx, (B, L, H), jnp.float32)
    params = init_params(kp, config["num_layers"], H, config["kernel_size"])

    out = stack_gated_cnn(x, params, kernel_size=config["kernel_size"])
    out = jax.block_until_ready(out)

    ref = _reference(x, params)
    assert out.shape == (B, L, H)
    assert jnp.allclose(out, ref, atol=2e-3, rtol=2e-3), "mismatch vs pure-JAX reference"
    print("KERNEL_OK")
</pallas_src>

<mosaic_0001>
module attributes {stable_mosaic.version = 11 : i64} {
  func.func @_stack_kernel(%arg0: i32, %arg1: i32, %arg2: memref<8x32xf32, #tpu.memory_space<vmem>>, %arg3: memref<1x1x32xf32, #tpu.memory_space<vmem>>, %arg4: memref<1x1x32xf32, #tpu.memory_space<vmem>>, %arg5: memref<1x32x32xbf16, #tpu.memory_space<vmem>>, %arg6: memref<1x1x32xf32, #tpu.memory_space<vmem>>, %arg7: memref<1x32x32xbf16, #tpu.memory_space<vmem>>, %arg8: memref<1x1x32xf32, #tpu.memory_space<vmem>>, %arg9: memref<1x1x32xf32, #tpu.memory_space<vmem>>, %arg10: memref<1x1x32xf32, #tpu.memory_space<vmem>>, %arg11: memref<8x32xf32, #tpu.memory_space<vmem>>, %arg12: memref<8x32xf32, #tpu.memory_space<vmem>>) attributes {dimension_semantics = [#tpu.dimension_semantics<parallel>, #tpu.dimension_semantics<arbitrary>], iteration_bounds = array<i64: 2, 2>, scalar_prefetch = 0 : i64, scratch_operands = 1 : i64, tpu.core_type = #tpu.core_type<tc>, window_params = [{transform_indices = @transform_0, window_bounds = array<i64: 8, 32>}, {transform_indices = @transform_1, window_bounds = array<i64: 1, 1, 32>}, {transform_indices = @transform_2, window_bounds = array<i64: 1, 1, 32>}, {transform_indices = @transform_3, window_bounds = array<i64: 1, 32, 32>}, {transform_indices = @transform_4, window_bounds = array<i64: 1, 1, 32>}, {transform_indices = @transform_5, window_bounds = array<i64: 1, 32, 32>}, {transform_indices = @transform_6, window_bounds = array<i64: 1, 1, 32>}, {transform_indices = @transform_7, window_bounds = array<i64: 1, 1, 32>}, {transform_indices = @transform_8, window_bounds = array<i64: 1, 1, 32>}, {transform_indices = @transform_9, window_bounds = array<i64: 8, 32>}]} {
    %c0_i32 = arith.constant 0 : i32
    %0 = arith.cmpi eq, %arg1, %c0_i32 : i32
    %1 = arith.extui %0 : i1 to i32
    %c0_i32_0 = arith.constant 0 : i32
    %2 = arith.cmpi ne, %1, %c0_i32_0 : i32
    scf.if %2 {
      %c0_41 = arith.constant 0 : index
      %c0_42 = arith.constant 0 : index
      %79 = vector.load %arg2[%c0_41, %c0_42] : memref<8x32xf32, #tpu.memory_space<vmem>>, vector<8x32xf32>
      %c0_43 = arith.constant 0 : index
      %c0_44 = arith.constant 0 : index
      %80 = vector.load %arg12[%c0_43, %c0_44] : memref<8x32xf32, #tpu.memory_space<vmem>>, vector<8x32xf32>
      tpu.vector_store %arg12[%c0_43, %c0_44], %79 {strides = array<i32>} : memref<8x32xf32, #tpu.memory_space<vmem>>, vector<8x32xf32>,
    } else {
    }
    %c0 = arith.constant 0 : index
    %c0_1 = arith.constant 0 : index
    %3 = vector.load %arg12[%c0, %c0_1] : memref<8x32xf32, #tpu.memory_space<vmem>>, vector<8x32xf32>
    %c0_2 = arith.constant 0 : index
    %c0_3 = arith.constant 0 : index
    %c0_4 = arith.constant 0 : index
    %4 = vector.load %arg3[%c0_2, %c0_3, %c0_4] : memref<1x1x32xf32, #tpu.memory_space<vmem>>, vector<1x1x32xf32>
    %5 = vector.shape_cast %4 : vector<1x1x32xf32> to vector<1x32xf32>
    %c0_5 = arith.constant 0 : index
    %c0_6 = arith.constant 0 : index
    %c0_7 = arith.constant 0 : index
    %6 = vector.load %arg4[%c0_5, %c0_6, %c0_7] : memref<1x1x32xf32, #tpu.memory_space<vmem>>, vector<1x1x32xf32>
    %7 = vector.shape_cast %6 : vector<1x1x32xf32> to vector<1x32xf32>
    %cst = arith.constant dense<0.000000e+00> : vector<8xf32>
    %8 = vector.multi_reduction <add>, %3, %cst [1] : vector<8x32xf32> to vector<8xf32>
    %9 = vector.shape_cast %8 : vector<8xf32> to vector<8x1xf32>
    %cst_8 = arith.constant 3.200000e+01 : f32
    %10 = vector.broadcast %cst_8 : f32 to vector<8x1xf32>
    %11 = arith.divf %9, %10 : vector<8x1xf32>
    %12 = vector.broadcast %11 : vector<8x1xf32> to vector<8x32xf32>
    %13 = arith.subf %3, %12 : vector<8x32xf32>
    %14 = arith.mulf %13, %13 : vector<8x32xf32>
    %cst_9 = arith.constant dense<0.000000e+00> : vector<8xf32>
    %15 = vector.multi_reduction <add>, %14, %cst_9 [1] : vector<8x32xf32> to vector<8xf32>
    %16 = vector.shape_cast %15 : vector<8xf32> to vector<8x1xf32>
    %cst_10 = arith.constant 3.200000e+01 : f32
    %17 = vector.broadcast %cst_10 : f32 to vector<8x1xf32>
    %18 = arith.divf %16, %17 : vector<8x1xf32>
    %19 = vector.broadcast %11 : vector<8x1xf32> to vector<8x32xf32>
    %20 = arith.subf %3, %19 : vector<8x32xf32>
    %cst_11 = arith.constant 9.99999974E-6 : f32
    %21 = vector.broadcast %cst_11 : f32 to vector<8x1xf32>
    %22 = arith.addf %18, %21 : vector<8x1xf32>
    %23 = math.rsqrt %22 : vector<8x1xf32>
    %24 = vector.broadcast %23 : vector<8x1xf32> to vector<8x32xf32>
    %25 = arith.mulf %20, %24 : vector<8x32xf32>
    %26 = vector.broadcast %5 : vector<1x32xf32> to vector<8x32xf32>
    %27 = arith.mulf %25, %26 : vector<8x32xf32>
    %28 = vector.broadcast %7 : vector<1x32xf32> to vector<8x32xf32>
    %29 = arith.addf %27, %28 : vector<8x32xf32>
    %30 = arith.truncf %29 : vector<8x32xf32> to vector<8x32xbf16>
    %c0_12 = arith.constant 0 : index
    %c0_13 = arith.constant 0 : index
    %c0_14 = arith.constant 0 : index
    %31 = vector.load %arg5[%c0_12, %c0_13, %c0_14] : memref<1x32x32xbf16, #tpu.memory_space<vmem>>, vector<1x32x32xbf16>
    %32 = vector.shape_cast %31 : vector<1x32x32xbf16> to vector<32x32xbf16>
    %cst_15 = arith.constant dense<0.000000e+00> : vector<8x32xf32>
    %33 = tpu.matmul %30, %32, %cst_15 {dimension_numbers = #tpu.dot_dimension_numbers<[1], [0], [0], [1], [0, 0, 1, 1], [], []>} : vector<8x32xbf16>, vector<32x32xbf16>, vector<8x32xf32> -> vector<8x32xf32>
    %c0_16 = arith.constant 0 : index
    %c0_17 = arith.constant 0 : index
    %c0_18 = arith.constant 0 : index
    %34 = vector.load %arg6[%c0_16, %c0_17, %c0_18] : memref<1x1x32xf32, #tpu.memory_space<vmem>>, vector<1x1x32xf32>
    %35 = vector.shape_cast %34 : vector<1x1x32xf32> to vector<1x32xf32>
    %36 = vector.broadcast %35 : vector<1x32xf32> to vector<8x32xf32>
    %37 = arith.addf %33, %36 : vector<8x32xf32>
    %cst_19 = arith.constant 0.000000e+00 : f32
    %38 = vector.broadcast %cst_19 : f32 to vector<8x32xf32>
    %39 = arith.maximumf %37, %38 : vector<8x32xf32>
    %40 = arith.truncf %39 : vector<8x32xf32> to vector<8x32xbf16>
    %c0_20 = arith.constant 0 : index
    %c0_21 = arith.constant 0 : index
    %c0_22 = arith.constant 0 : index
    %41 = vector.load %arg7[%c0_20, %c0_21, %c0_22] : memref<1x32x32xbf16, #tpu.memory_space<vmem>>, vector<1x32x32xbf16>
    %42 = vector.shape_cast %41 : vector<1x32x32xbf16> to vector<32x32xbf16>
    %cst_23 = arith.constant dense<0.000000e+00> : vector<8x32xf32>
    %43 = tpu.matmul %40, %42, %cst_23 {dimension_numbers = #tpu.dot_dimension_numbers<[1], [0], [0], [1], [0, 0, 1, 1], [], []>} : vector<8x32xbf16>, vector<32x32xbf16>, vector<8x32xf32> -> vector<8x32xf32>
    %c0_24 = arith.constant 0 : index
    %c0_25 = arith.constant 0 : index
    %c0_26 = arith.constant 0 : index
    %44 = vector.load %arg8[%c0_24, %c0_25, %c0_26] : memref<1x1x32xf32, #tpu.memory_space<vmem>>, vector<1x1x32xf32>
    %45 = vector.shape_cast %44 : vector<1x1x32xf32> to vector<1x32xf32>
    %46 = vector.broadcast %45 : vector<1x32xf32> to vector<8x32xf32>
    %47 = arith.addf %43, %46 : vector<8x32xf32>
    %48 = arith.addf %47, %29 : vector<8x32xf32>
    %c0_27 = arith.constant 0 : index
    %c0_28 = arith.constant 0 : index
    %c0_29 = arith.constant 0 : index
    %49 = vector.load %arg9[%c0_27, %c0_28, %c0_29] : memref<1x1x32xf32, #tpu.memory_space<vmem>>, vector<1x1x32xf32>
    %50 = vector.shape_cast %49 : vector<1x1x32xf32> to vector<1x32xf32>
    %c0_30 = arith.constant 0 : index
    %c0_31 = arith.constant 0 : index
    %c0_32 = arith.constant 0 : index
    %51 = vector.load %arg10[%c0_30, %c0_31, %c0_32] : memref<1x1x32xf32, #tpu.memory_space<vmem>>, vector<1x1x32xf32>
    %52 = vector.shape_cast %51 : vector<1x1x32xf32> to vector<1x32xf32>
    %cst_33 = arith.constant dense<0.000000e+00> : vector<8xf32>
    %53 = vector.multi_reduction <add>, %48, %cst_33 [1] : vector<8x32xf32> to vector<8xf32>
    %54 = vector.shape_cast %53 : vector<8xf32> to vector<8x1xf32>
    %cst_34 = arith.constant 3.200000e+01 : f32
    %55 = vector.broadcast %cst_34 : f32 to vector<8x1xf32>
    %56 = arith.divf %54, %55 : vector<8x1xf32>
    %57 = vector.broadcast %56 : vector<8x1xf32> to vector<8x32xf32>
    %58 = arith.subf %48, %57 : vector<8x32xf32>
    %59 = arith.mulf %58, %58 : vector<8x32xf32>
    %cst_35 = arith.constant dense<0.000000e+00> : vector<8xf32>
    %60 = vector.multi_reduction <add>, %59, %cst_35 [1] : vector<8x32xf32> to vector<8xf32>
    %61 = vector.shape_cast %60 : vector<8xf32> to vector<8x1xf32>
    %cst_36 = arith.constant 3.200000e+01 : f32
    %62 = vector.broadcast %cst_36 : f32 to vector<8x1xf32>
    %63 = arith.divf %61, %62 : vector<8x1xf32>
    %64 = vector.broadcast %56 : vector<8x1xf32> to vector<8x32xf32>
    %65 = arith.subf %48, %64 : vector<8x32xf32>
    %cst_37 = arith.constant 9.99999974E-6 : f32
    %66 = vector.broadcast %cst_37 : f32 to vector<8x1xf32>
    %67 = arith.addf %63, %66 : vector<8x1xf32>
    %68 = math.rsqrt %67 : vector<8x1xf32>
    %69 = vector.broadcast %68 : vector<8x1xf32> to vector<8x32xf32>
    %70 = arith.mulf %65, %69 : vector<8x32xf32>
    %71 = vector.broadcast %50 : vector<1x32xf32> to vector<8x32xf32>
    %72 = arith.mulf %70, %71 : vector<8x32xf32>
    %73 = vector.broadcast %52 : vector<1x32xf32> to vector<8x32xf32>
    %74 = arith.addf %72, %73 : vector<8x32xf32>
    %c0_38 = arith.constant 0 : index
    %c0_39 = arith.constant 0 : index
    %75 = vector.load %arg12[%c0_38, %c0_39] : memref<8x32xf32, #tpu.memory_space<vmem>>, vector<8x32xf32>
    tpu.vector_store %arg12[%c0_38, %c0_39], %74 {strides = array<i32>} : memref<8x32xf32, #tpu.memory_space<vmem>>, vector<8x32xf32>,
    %c1_i32 = arith.constant 1 : i32
    %76 = arith.cmpi eq, %arg1, %c1_i32 : i32
    %77 = arith.extui %76 : i1 to i32
    %c0_i32_40 = arith.constant 0 : i32
    %78 = arith.cmpi ne, %77, %c0_i32_40 : i32
    scf.if %78 {
      %c0_41 = arith.constant 0 : index
      %c0_42 = arith.constant 0 : index
      %79 = vector.load %arg11[%c0_41, %c0_42] : memref<8x32xf32, #tpu.memory_space<vmem>>, vector<8x32xf32>
      tpu.vector_store %arg11[%c0_41, %c0_42], %74 {strides = array<i32>} : memref<8x32xf32, #tpu.memory_space<vmem>>, vector<8x32xf32>,
    } else {
    }
    return
  }
  func.func @transform_0(%arg0: i32, %arg1: i32) -> (i32, i32) {
    %c0_i32 = arith.constant 0 : i32
    %c0_i32_0 = arith.constant 0 : i32
    return %arg0, %c0_i32 : i32, i32
  }
  func.func @transform_1(%arg0: i32, %arg1: i32) -> (i32, i32, i32) {
    %c0_i32 = arith.constant 0 : i32
    %c0_i32_0 = arith.constant 0 : i32
    %c0_i32_1 = arith.constant 0 : i32
    return %arg1, %c0_i32, %c0_i32_0 : i32, i32, i32
  }
  func.func @transform_2(%arg0: i32, %arg1: i32) -> (i32, i32, i32) {
    %c0_i32 = arith.constant 0 : i32
    %c0_i32_0 = arith.constant 0 : i32
    %c0_i32_1 = arith.constant 0 : i32
    return %arg1, %c0_i32, %c0_i32_0 : i32, i32, i32
  }
  func.func @transform_3(%arg0: i32, %arg1: i32) -> (i32, i32, i32) {
    %c0_i32 = arith.constant 0 : i32
    %c0_i32_0 = arith.constant 0 : i32
    %c0_i32_1 = arith.constant 0 : i32
    return %arg1, %c0_i32, %c0_i32_0 : i32, i32, i32
  }
  func.func @transform_4(%arg0: i32, %arg1: i32) -> (i32, i32, i32) {
    %c0_i32 = arith.constant 0 : i32
    %c0_i32_0 = arith.constant 0 : i32
    %c0_i32_1 = arith.constant 0 : i32
    return %arg1, %c0_i32, %c0_i32_0 : i32, i32, i32
  }
  func.func @transform_5(%arg0: i32, %arg1: i32) -> (i32, i32, i32) {
    %c0_i32 = arith.constant 0 : i32
    %c0_i32_0 = arith.constant 0 : i32
    %c0_i32_1 = arith.constant 0 : i32
    return %arg1, %c0_i32, %c0_i32_0 : i32, i32, i32
  }
  func.func @transform_6(%arg0: i32, %arg1: i32) -> (i32, i32, i32) {
    %c0_i32 = arith.constant 0 : i32
    %c0_i32_0 = arith.constant 0 : i32
    %c0_i32_1 = arith.constant 0 : i32
    return %arg1, %c0_i32, %c0_i32_0 : i32, i32, i32
  }
  func.func @transform_7(%arg0: i32, %arg1: i32) -> (i32, i32, i32) {
    %c0_i32 = arith.constant 0 : i32
    %c0_i32_0 = arith.constant 0 : i32
    %c0_i32_1 = arith.constant 0 : i32
    return %arg1, %c0_i32, %c0_i32_0 : i32, i32, i32
  }
  func.func @transform_8(%arg0: i32, %arg1: i32) -> (i32, i32, i32) {
    %c0_i32 = arith.constant 0 : i32
    %c0_i32_0 = arith.constant 0 : i32
    %c0_i32_1 = arith.constant 0 : i32
    return %arg1, %c0_i32, %c0_i32_0 : i32, i32, i32
  }
  func.func @transform_9(%arg0: i32, %arg1: i32) -> (i32, i32) {
    %c0_i32 = arith.constant 0 : i32
    %c0_i32_0 = arith.constant 0 : i32
    return %arg0, %c0_i32 : i32, i32
  }
}

</mosaic_0001>

<bundles_post_ra>
// kernel: _stack_impl.1
= control target key start
LH: loop header
LB: loop body
LE: loop exit
PB: predicated region body
PF: predicated region fallthrough
CT: control target
= control target key end

     0   :  { %s1336_s0 = inlined_call_operand.vmem [shape: f32[16,32], index: 0, kind: input, shape index: {}]   ;;  %s1337_s1 = inlined_call_operand.vmem [shape: f32[2,1,32], index: 1, kind: input, shape index: {}]   ;;  %s1338_s2 = inlined_call_operand.vmem [shape: f32[2,1,32], index: 2, kind: input, shape index: {}]   ;;  %s1339_s3 = inlined_call_operand.vmem [shape: bf16[2,32,32], index: 3, kind: input, shape index: {}]   ;;  %s1340_s4 = inlined_call_operand.vmem [shape: f32[2,1,32], index: 4, kind: input, shape index: {}]   ;;  %s1341_s5 = inlined_call_operand.vmem [shape: bf16[2,32,32], index: 5, kind: input, shape index: {}]   ;;  %s1342_s6 = inlined_call_operand.vmem [shape: f32[2,1,32], index: 6, kind: input, shape index: {}]   ;;  %s1343_s7 = inlined_call_operand.vmem [shape: f32[2,1,32], index: 7, kind: input, shape index: {}]   ;;  %s1344_s8 = inlined_call_operand.vmem [shape: f32[2,1,32], index: 8, kind: input, shape index: {}]   ;;  %s1345_s9 = inlined_call_operand.hbm [shape: f32[16,32], index: 9, kind: output, shape index: {}]  }
   0x1   :  { %1359 = sst [smem:[#allocation17_spill]] %s1336_s0 }
   0x2   :  { %1360 = sst [smem:[#allocation18_spill]] %s1345_s9 }
   0x3   :  { %14 = vsyncpa [#allocation4], 0 }
   0x4   :  { %16 = vsyncpa [#allocation4 + $0x1], 0  ;;  %s1120_s30 = smov 0   ;;  %s1122_s10 = smov 0  }
   0x5   :  { %s1124_s11 = smov 0   ;;  %s1126_s12 = smov 0  }
   0x6   :  { %s1128_s13 = smov 0   ;;  %s1130_s14 = smov 0  }
   0x7   :  { %s1132_s15 = smov 0   ;;  %s1134_s16 = smov 0  }
   0x8 LB: > { %1361 = sst [smem:[#allocation6_spill]] %s1037_s30  ;;  %s837_s17 = sadd.s32 4294967295, %s1065_s16   ;;  %s1065_s16 = sphi %s1134_s16, %s22_s16   ;;  %s1061_s15 = sphi %s1132_s15, %s1390_s15   ;;  %s1057_s14 = sphi %s1130_s14, %s1389_s14   ;;  %s1053_s13 = sphi %s1128_s13, %s1388_s13   ;;  %s1049_s12 = sphi %s1126_s12, %s1387_s12   ;;  %s1045_s11 = sphi %s1124_s11, %s1386_s11   ;;  %s1041_s10 = sphi %s1122_s10, %s1385_s10   ;;  %s1037_s30 = sphi %s1120_s30, %s1384_s30  }
   0x9   : > { %1362 = sst [smem:[#allocation7_spill]] %s1041_s10  ;;  %s838_s18 = sadd.s32 4294967294, %s1065_s16  }
   0xa   : > { %1363 = sst [smem:[#allocation8_spill]] %s1045_s11  ;;  %s31_s19 = sadd.s32 1, %s1057_s14 }
   0xb   : > { %1364 = sst [smem:[#allocation9_spill]] %s1057_s14  ;;  %p32_p0 = scmp.ge.s32.totalorder %s31_s19, 2 }
   0xc   : > { %1365 = sst [smem:[#allocation10_spill]] %s1061_s15  ;;  %s34_s20 = sadd.s32 1, %s1061_s15 }
   0xd   : > { %1366 = sst [smem:[#allocation11_spill]] %s1065_s16  ;;  %p285_p1 = scmp.ne.s32.totalorder %s1045_s11, %s1041_s10 }
   0xe   : > { %p286_p2 = scmp.eq.s32.totalorder %s837_s17, 3  ;;  %s1392_s19 = smov (%p32_p0, %s31_s19), 0 }
   0xf   : > { %1367 = sst [smem:[#allocation12_spill]] %s1392_s19  ;;  %s1394_s20 = smov (!%p32_p0, %s34_s20), %s1061_s15 }
  0x10   : > { %p1169_p3 = por %p286_p2, %p285_p1  ;;  %p291_p4 = scmp.ne.s32.totalorder %s1041_s10, %s1037_s30 }
  0x11   : > { %p36_p5 = scmp.ge.s32.totalorder %s1394_s20, 2  ;;  %p292_p6 = scmp.eq.s32.totalorder %s838_s18, 3 }
  0x12   : > { %s1368_s21 = scalar_select %p1169_p3, 1, 0 }
  0x13   : > { %p841_p7 = scmp.ge.s32.totalorder %s1065_s16, 1  ;;  %p369_p8 = scmp.lt.s32.totalorder %s1065_s16, 5 }
  0x14   : > { %1369 = sst [smem:[#allocation13_spill]] %s1368_s21  ;;  %s1396_s20 = smov (%p36_p5, %s1394_s20), 0 }
  0x15   : > { %1370 = sst [smem:[#allocation14_spill]] %s1396_s20  ;;  %p1179_p9 = por %p292_p6, %p291_p4 }
  0x16   : > { %p370_p10 = pnand %p841_p7, %p369_p8  ;;  %s272_s23 = ssub.s32 %s1061_s15, %s1396_s20 }
  0x17   : > { %s1371_s22 = scalar_select %p1179_p9, 1, 0 }
  0x18   : > { %s275_s24 = sadd.s32 1, %s1045_s11  ;;  %p273_p11 = scmp.eq.s32.totalorder %s272_s23, 0 }
  0x19   : > { %1372 = sst [smem:[#allocation15_spill]] %s1371_s22  ;;  %373 = sbr.rel (%p370_p10) target bundleno = 1133 (0x46d), region = 56 }
  0x1a   : > { %s1187_s25 = scalar_select %p273_p11, %s1045_s11, %s275_s24  }
  0x1b   : > { %s1347_s26 = sand.u32 (!%p370_p10), 1, %s1041_s10   ;;  %p432_p12 = scmp.lt.s32.totalorder (!%p370_p10), %s1053_s13, 1 }
  0x1c   : > { %1373 = sst [smem:[#allocation16_spill]] %s1187_s25  ;;  %s1193_s27 = sshll.u32 (!%p370_p10), %s1347_s26, 3 }
  0x1d   : > { %p436_p13 = scmp.lt.s32.totalorder (!%p370_p10), %s1049_s12, 1  ;;  %s1374_s0 = sld [smem:[#allocation17_spill]] (!%p370_p10) }
  0x1e   : > { %p848_p0 = scmp.ne.s32.totalorder (!%p370_p10), %s1049_s12, 0 }
  0x20   : > { %s433_s28 = scalar_select %p432_p12, %s1053_s13, 1 }
  0x21   : > { %s1198_s29 = scalar_select %p436_p13, %s1049_s12, 1 }
  0x22   : > { %s843_s17 = sshll.u32 %s433_s28, 3  ;;  %468 = sbr.rel (%p848_p0) target bundleno = 41 (0x29), region = 60  ;;  %vm470_vm0 = vcmask (!%p848_p0), 261120  }
  0x23   : > { %s435_s24 = scalar_lea.vmem %s1374_s0, %s843_s17  ;;  %s866_s11 = sshll.u32 %s1198_s29, 4 }
  0x24   : > { %s446_s16 = scalar_lea.vmem %s1339_s3, %s866_s11  ;;  %s449_s28 = scalar_lea.vmem %s1340_s4, %s1198_s29  ;;  %v469_v0 = vld [vmem:[%s435_s24] sm:$0xff] (!%p848_p0) }
  0x25   : > { %s1222_s17 = scalar_lea.vmem %s1341_s5, %s866_s11  ;;  %s457_s23 = scalar_lea.vmem %s1342_s6, %s1198_s29  ;;  %471 = vst.msk [vmem:[#allocation2] sm:$0xff] (!%p848_p0), %vm470_vm0, %v469_v0 }
  0x26   : > { %s460_s25 = scalar_lea.vmem %s1343_s7, %s1198_s29  ;;  %s463_s22 = scalar_lea.vmem %s1344_s8, %s1198_s29 }
  0x27   : > { %s431_s0 = scalar_lea.vmem [#allocation3], %s1193_s27 }
  0x29 PF: > { %vm475_vm1 = vcmask 261120   ;;  %v963_v8 = vld [vmem:[%s446_s16] sm:$0xff]   ;;  %v1067_v9 = vmov 0.0   ;;  %v964_v10 = vld [vmem:[%s446_s16 + $0x8] sm:$0xff]   ;;  %vm1068_vm2 = vmmov 0   ;;  %s1375_s11 = scalar_lea.vmem %s1337_s1, %s1198_s29  ;;  %s1376_s21 = scalar_lea.vmem %s1338_s2, %s1198_s29 }
  0x2a   : > { %874 = vmatprep.subr.bf16.mxu0 %v1067_v9  ;;  %882 = vmatprep.subr.bf16.mxu1 %v1067_v9  ;;  %v849_v15 = vld [vmem:[%s1375_s11] ss:$0 sm:$0xff]  ;;  %v966_v22 = vld [vmem:[%s1222_s17 + $0x8] sm:$0xff]   ;;  %p861_p1 = scmp.ne.s32.totalorder %s1049_s12, 1 }
  0x2b   : > { %875 = vmatpush3.bf16.msra.mxu0 %v963_v8  ;;  %878 = vmatprep.mubr.msk.bf16.mxu0 %vm1068_vm2, %v1067_v9  ;;  %v850_v17 = vld [vmem:[%s1376_s21] ss:$0 sm:$0xff] }
  0x2c   : > { %v472_v1 = vld [vmem:[#allocation2] sm:$0xff]  ;;  %876 = vmatprep.subr.bf16.mxu0 %v1067_v9  ;;  %886 = vmatprep.mubr.msk.bf16.mxu1 %vm1068_vm2, %v1067_v9 }
  0x2d   : > { %v476_v2 = vsel %vm475_vm1, %v472_v1, 0.0  ;;  %v965_v21 = vld [vmem:[%s1222_s17] sm:$0xff]  }
  0x2e   : > { %477 = vadd.xlane.f32.xlu0 %v476_v2  ;;  %883 = vmatpush3.bf16.msra.mxu1 %v965_v21  ;;  %v851_v23 = vld [vmem:[%s449_s28] ss:$0 sm:$0xff] }
  0x2f   : > { %877 = vmatpush3.bf16.msra.mxu0 %v964_v10  ;;  %884 = vmatprep.subr.bf16.mxu1 %v1067_v9  ;;  %v855_v31 = vld [vmem:[%s457_s23] ss:$0 sm:$0xff] }
  0x30   : > { %v859_v48 = vld [vmem:[%s460_s25] ss:$0 sm:$0xff] }
  0x31   : > { %v860_v50 = vld [vmem:[%s463_s22] ss:$0 sm:$0xff] }
  0x32   : > { %885 = vmatpush3.bf16.msra.mxu1 %v966_v22 }
  0xbb   : > { %v478_v3 = vpop.xlane.xlu0 %477 }
  0xbc   : > { %v480_v4 = vmul.f32 0.03125, %v478_v3 }
  0xbe   : > { %v481_v5 = vsub.f32 %v472_v1, %v480_v4 }
  0xc0   : > { %v482_v6 = vmul.f32 %v481_v5, %v481_v5 }
  0xc2   : > { %v483_v7 = vsel %vm475_vm1, %v482_v6, 0.0 }
  0xc3   : > { %484 = vadd.xlane.f32.xlu0 %v483_v7 }
 0x150   : > { %v485_v11 = vpop.xlane.xlu0 %484 }
 0x151   : > { %v486_v12 = vmul.f32 0.03125, %v485_v11 }
 0x153   : > { %v487_v13 = vadd.f32 1e-05, %v486_v12 }
 0x155   : > { %967 = vrsqrt.f32 %v487_v13 }
 0x15f   : > { %v968_v14 = vpop.eup %967 }
 0x160   : > { %v489_v16 = vmul.f32 %v968_v14, %v481_v5 }
 0x162   : > { %v496_v18 = vmul.f32 %v849_v15, %v489_v16 }
 0x164   : > { %v503_v19 = vadd.f32 %v850_v17, %v496_v18 }
 0x166   : > { %v504_v20 = vpack.c.bf16 %v503_v19, %v503_v19 }
 0x168   : > { %879 = vmatmul.mubr.msk.bf16.vlgmr.msra.gmra.mrb[0].mxu0 %vm475_vm1, %v504_v20 }
 0x23b   : > { %v565_v24 = vpop.f32.mrb[0].mxu0 }
 0x23c   : > { %v566_v25 = vadd.f32 %v851_v23, %v565_v24  ;;  %v880_v26 = vpop.f32.mrb[1].mxu0 }
 0x23d   : > { %v568_v27 = vpop.f32.mrb[2].mxu0 }
 0x23e   : > { %v571_v28 = vmax.f32 %v566_v25, 0.0  ;;  %v881_v29 = vpop.f32.mrb[3].mxu0 }
 0x240   : > { %v572_v30 = vpack.c.bf16 %v571_v28, %v571_v28 }
 0x242   : > { %887 = vmatmul.mubr.msk.bf16.vlgmr.msra.gmra.mrb[0].mxu1 %vm475_vm1, %v572_v30 }
 0x315   : > { %v633_v32 = vpop.f32.mrb[0].mxu1 }
 0x316   : > { %v634_v33 = vadd.f32 %v855_v31, %v633_v32  ;;  %v888_v34 = vpop.f32.mrb[1].mxu1 }
 0x317   : > { %v636_v35 = vpop.f32.mrb[2].mxu1 }
 0x318   : > { %v889_v36 = vpop.f32.mrb[3].mxu1  ;;  %v639_v37 = vadd.f32 %v634_v33, %v503_v19 }
 0x31a   : > { %v642_v38 = vsel %vm475_vm1, %v639_v37, 0.0 }
 0x31b   : > { %643 = vadd.xlane.f32.xlu1 %v642_v38 }
 0x3a8   : > { %v644_v39 = vpop.xlane.xlu1 %643 }
 0x3a9   : > { %v645_v40 = vmul.f32 0.03125, %v644_v39 }
 0x3ab   : > { %v646_v41 = vsub.f32 %v639_v37, %v645_v40 }
 0x3ad   : > { %v647_v42 = vmul.f32 %v646_v41, %v646_v41 }
 0x3af   : > { %v648_v43 = vsel %vm475_vm1, %v647_v42, 0.0 }
 0x3b0   : > { %649 = vadd.xlane.f32.xlu1 %v648_v43 }
 0x43d   : > { %v650_v44 = vpop.xlane.xlu1 %649 }
 0x43e   : > { %v651_v45 = vmul.f32 0.03125, %v650_v44 }
 0x440   : > { %v652_v46 = vadd.f32 1e-05, %v651_v45 }
 0x442   : > { %969 = vrsqrt.f32 %v652_v46 }
 0x44c   : > { %v970_v47 = vpop.eup %969 }
 0x44d   : > { %v654_v49 = vmul.f32 %v970_v47, %v646_v41  ;;  %673 = sbr.rel (%p861_p1) target bundleno = 1108 (0x454), region = 64 }
 0x44f   : > { %v661_v51 = vmul.f32 %v859_v48, %v654_v49 }
 0x451   : > { %v668_v52 = vadd.f32 %v860_v50, %v661_v51 }
 0x453   : > { %669 = vst.msk [vmem:[#allocation2] sm:$0xff] %vm475_vm1, %v668_v52  ;;  %674 = vst.msk [vmem:[%s431_s0] sm:$0xff] (!%p861_p1), %vm475_vm1, %v668_v52 }
 0x454 PF: > { %s1377_s25 = sld [smem:[#allocation7_spill]]  ;;  %s863_s30 = sshll.u32 %s1053_s13, 7 }
 0x455   : > { %s1379_s22 = sld [smem:[#allocation18_spill]]  ;;  %s689_s11 = sshll.u32 %s431_s0, 4  ;;  %s690_s11 = int_to_ptr.vmem [resolvable:$true] %s689_s11 }
 0x456   : > { %s971_s19 = scalar_lea.vmem %s690_s11, 128  ;;  %s1069_s21 = smov [#allocation3]  }
 0x457   : > { %p972_p2 = scmp.ne.s32.totalorder %s690_s11, %s971_s19  ;;  %s975_s24 = sshll.u32 %s1069_s21, 4  ;;  %s976_s24 = int_to_ptr.vmem [resolvable:$false] %s975_s24 }
 0x458   : > { %s977_s18 = scalar_lea.vmem %s976_s24, 256  ;;  %p978_p6 = scmp.lt.s32.totalorder %s690_s11, %s976_s24 }
 0x459   : > { %p973_p4 = pnand %p972_p2, %p1169_p3  ;;  %p979_p7 = scmp.lt.s32.totalorder %s977_s18, %s971_s19 }
 0x45a   : > { %s1380_s12 = sand.u32 1, %s1377_s25  }
 0x45b   : > { %s1285_s10 = scalar_lea.hbm %s1379_s22, %s863_s30  ;;  %s676_s16 = scalar_lea.sflag [#allocation4], %s1380_s12 }
 0x45c   : > { %p974_p5 = pneg %p973_p4  ;;  %p980_p8 = por %p979_p7, %p978_p6 }
 0x45e   : > { %p981_p10 = pnand %p980_p8, %p974_p5 }
 0x460   : > { %984 = shalt.err (!%p981_p10)
}
 0x461   : > { %s985_s0 = scalar_lea.hbm %s1285_s10, 128  ;;  %s989_s20 = scalar_lea.hbm %s1379_s22, 256 }
 0x462   : > { %p986_p11 = scmp.ne.s32.totalorder %s1285_s10, %s985_s0  ;;  %p990_p0 = scmp.lt.u32.totalorder %s1285_s10, %s1379_s22 }
 0x463   : > { %p991_p1 = scmp.lt.u32.totalorder %s989_s20, %s985_s0  ;;  %p993_p4 = scmp.lt.u32.totalorder %s985_s0, %s1285_s10 }
 0x464   : > { %p987_p12 = pnand %p986_p11, %p1169_p3 }
 0x465   : > { %p992_p2 = por %p991_p1, %p990_p0 }
 0x466   : > { %p988_p13 = pneg %p987_p12 }
 0x467   : > { %p994_p5 = por %p993_p4, %p992_p2 }
 0x469   : > { %p995_p6 = pnand %p994_p5, %p988_p13 }
 0x46b   : > { %998 = shalt.err (!%p995_p6)
}
 0x46c   : > { %890 = dma.vmem_to_hbm [thread:$0]  (%p1169_p3), %s690_s11, 128, %s1285_s10, %s676_s16  }
 0x46d PF: > { %s1381_s17 = sld [smem:[#allocation11_spill]]  ;;  %s1382_s23 = sld [smem:[#allocation6_spill]] }
 0x473   : > { %p896_p7 = scmp.ge.s32.totalorder %s1381_s17, 2  ;;  %s701_s25 = sand.u32 1, %s1382_s23  }
 0x474   : > { %s702_s30 = scalar_lea.sflag [#allocation4], %s701_s25 }
 0x475   : > { %p893_p8 = pnand %p896_p7, %p1179_p9 }
 0x477   : > { %1032 = dma.done.wait (!%p893_p8), %s702_s30, 128  }
 0x478   : > { %1034 = vsyncadd (!%p893_p8), %s702_s30, 4294967168  ;;  %s22_s16 = sadd.s32 1, %s1381_s17   ;;  %s1384_s30 = sld [smem:[#allocation7_spill]] }
 0x479   : > { %p19_p10 = scmp.ge.s32.totalorder %s22_s16, 6   ;;  %s1385_s10 = sld [smem:[#allocation8_spill]] }
 0x47a   : > { %s1386_s11 = sld [smem:[#allocation16_spill]]  ;;  %s1387_s12 = sld [smem:[#allocation9_spill]] }
 0x47b   : > { %s1388_s13 = sld [smem:[#allocation10_spill]]  ;;  %s1389_s14 = sld [smem:[#allocation12_spill]] }
 0x47c   : > { %s1390_s15 = sld [smem:[#allocation14_spill]]  ;;  %21 = sbr.rel (!%p19_p10) target bundleno = 8 (0x8), region = 123 }
 0x483   :  { %707 = vsyncpa [#allocation4], 1 }
 0x484   :  { %709 = vsyncpa [#allocation4 + $0x1], 1 }

</bundles_post_ra>
